<compile_context>
chip_gen: v5e
topology: v5e:2x2
jax: 0.10.0
libtpu: 0.0.40
codegen_flags: <defaults>
</compile_context>

<pallas_src>
import functools
import math

import jax
import jax.numpy as jnp
from jax.experimental import pallas as pl
from jax.experimental.pallas import tpu as pltpu

_LEAKY_SLOPE = 0.01          # torch.nn.LeakyReLU default negative_slope
_SOFTPLUS_THRESHOLD = 20.0   # torch.nn.Softplus default threshold (beta=1)


def _leaky_relu(x):
    return jnp.where(x >= 0, x, _LEAKY_SLOPE * x)


def _softplus(x):
    # Matches torch.nn.Softplus(beta=1, threshold=20): linear above threshold.
    safe = jnp.minimum(x, _SOFTPLUS_THRESHOLD)
    return jnp.where(x > _SOFTPLUS_THRESHOLD, x, jnp.log1p(jnp.exp(safe)))


def _round_up(x, m):
    return ((x + m - 1) // m) * m


def _encoder_kernel(x_ref, eps_ref, w_ref, b_ref, z_ref, logp_ref):
    # x_ref:    [TB, D1, D2]  input tile (raw, unflattened)
    # eps_ref:  [TB, latent]  noise tile
    # w_ref:    [L, W, W]     bf16 zero-padded weights; last layer = fused heads
    # b_ref:    [L, 1, W]     f32  zero-padded biases
    # z_ref:    [TB, latent]  output: z = mu + std * eps
    # logp_ref: [TB, latent]  output: per-dim log_prob (reference formula)
    tb, d1, d2 = x_ref.shape
    in_dim = d1 * d2
    n_layers, _, width = w_ref.shape
    latent_dim = z_ref.shape[-1]

    # nn.Flatten(1, 2) + zero-extend to the slab width W, done on loaded vregs
    # (no host-side reshape / pad XLA ops).
    x3 = x_ref[...].astype(jnp.float32)
    parts = [x3[:, j, :] for j in range(d1)]
    if in_dim < width:
        parts.append(jnp.zeros((tb, width - in_dim), jnp.float32))
    h = jnp.concatenate(parts, axis=-1) if len(parts) > 1 else parts[0]

    # Hidden Linear + LeakyReLU stack.  Padded columns stay exactly 0
    # (zero weights + zero bias -> LeakyReLU(0) = 0), so they never contribute.
    # TODO(synk): switch to lax.fori_loop with a dynamic w_ref[l] index if the
    # layer count grows beyond a handful (bounds code size / live ranges).
    for l in range(n_layers - 1):
        acc = jnp.dot(h.astype(jnp.bfloat16), w_ref[l],
                      preferred_element_type=jnp.float32) + b_ref[l]
        h = _leaky_relu(acc)

    # Fused heads: one matmul yields [mu | log_var] in the first 2*latent cols.
    head = jnp.dot(h.astype(jnp.bfloat16), w_ref[n_layers - 1],
                   preferred_element_type=jnp.float32) + b_ref[n_layers - 1]
    # LeakyReLU on mu is intentional: mu_net = Linear + LeakyReLU in the spec.
    mu = _leaky_relu(head[:, :latent_dim])
    log_var = _softplus(head[:, latent_dim:2 * latent_dim])

    # reparameterize: z = mu + exp(0.5 * log_var) * eps
    eps = eps_ref[...].astype(jnp.float32)
    z = mu + jnp.exp(0.5 * log_var) * eps

    # Reference formula (per latent dimension, includes the D factor, no sum):
    #   -0.5*D*log(2*pi) - 0.5*log_var - 0.5*(z - mu)^2 * exp(-log_var)
    # and (z - mu)^2 * exp(-log_var) == eps^2 exactly since z - mu = std * eps.
    log_const = jnp.float32(-0.5 * latent_dim * math.log(2.0 * math.pi))
    log_p = log_const - 0.5 * log_var - 0.5 * (eps * eps)

    # Two direct lane-contiguous stores (no concatenate / post-kernel slicing).
    # TODO(synk): if latent_dim grows, lane-pad each output to a multiple of
    # 128 so these become unmasked full-vreg stores.
    z_ref[...] = z
    logp_ref[...] = log_p


def init_params(key, encoder_dims, latent_dim):
    """Deterministic synthetic parameters (shapes match the PyTorch module)."""
    params = {"net": [], "mu": None, "log_var": None}
    dims = list(encoder_dims)
    for i in range(len(dims) - 1):
        key, kw, kb = jax.random.split(key, 3)
        scale = 1.0 / math.sqrt(dims[i])
        w = jax.random.uniform(kw, (dims[i], dims[i + 1]), jnp.float32, -scale, scale)
        b = jax.random.uniform(kb, (dims[i + 1],), jnp.float32, -scale, scale)
        params["net"].append((w, b))
    for name in ("mu", "log_var"):
        key, kw, kb = jax.random.split(key, 3)
        scale = 1.0 / math.sqrt(dims[-1])
        w = jax.random.uniform(kw, (dims[-1], latent_dim), jnp.float32, -scale, scale)
        b = jax.random.uniform(kb, (latent_dim,), jnp.float32, -scale, scale)
        params[name] = (w, b)
    return params


def pack_params(params):
    """Pack every Linear into two lane-aligned slabs (once, outside jit).

    Returns (w_slab[bf16, L, W, W], b_slab[f32, L, 1, W]); the last layer is
    the fused [mu | log_var] head.
    """
    ws = [w for w, _ in params["net"]]
    bs = [b for _, b in params["net"]]
    w_head = jnp.concatenate([params["mu"][0], params["log_var"][0]], axis=1)
    b_head = jnp.concatenate([params["mu"][1], params["log_var"][1]], axis=0)
    ws.append(w_head)
    bs.append(b_head)

    max_true = max([ws[0].shape[0]] + [w.shape[1] for w in ws])
    # 256 alignment feeds v6e/v7x's 256x256 MXU when layers are wide; 128 keeps
    # v5e's 128x128 MXUs (and toy shapes) tight.
    align = 256 if max_true >= 192 else 128
    width = _round_up(max_true, align)

    # TODO(synk): for strongly heterogeneous encoder_dims, pack ragged per-layer
    # [K_l, N_l] blocks (each (8,128)-rounded) instead of max-width padding.
    n_layers = len(ws)
    w_slab = jnp.zeros((n_layers, width, width), jnp.float32)
    b_slab = jnp.zeros((n_layers, 1, width), jnp.float32)
    for l, (w, b) in enumerate(zip(ws, bs)):
        w_slab = w_slab.at[l, : w.shape[0], : w.shape[1]].set(w)
        b_slab = b_slab.at[l, 0, : b.shape[0]].set(b)
    return w_slab.astype(jnp.bfloat16), b_slab


@jax.jit
def _encoder_apply(x, eps, w_slab, b_slab):
    """One pallas_call producing BOTH z and log_p; no host-side pre/post ops."""
    b_sz, d1, d2 = x.shape
    latent_dim = eps.shape[-1]
    n_layers, _, width = w_slab.shape
    assert d1 * d2 <= width and 2 * latent_dim <= width

    # Batch tiling: full batch in one tile when small; 256-row tiles otherwise.
    # "parallel" lets v7x's two TensorCores split batch tiles (neutral on
    # v5e/v6e); the weight/bias slabs keep a constant index_map so they stay
    # VMEM-resident across tiles.
    tb = b_sz if b_sz <= 512 else 256
    grid = (pl.cdiv(b_sz, tb),)

    # Explicit VMEM budget: once a grid exists, Pallas double-buffers inputs.
    def nbytes(a):
        return a.size * a.dtype.itemsize
    tile_bytes = (tb * d1 * d2 * x.dtype.itemsize
                  + tb * latent_dim * 4 * 3      # eps + two outputs
                  + tb * width * 4 * 4)          # activation working set
    vmem_limit = int(min(max(2 * (nbytes(w_slab) + nbytes(b_slab) + tile_bytes)
                             + (4 << 20), 8 << 20), 64 << 20))

    z, log_p = pl.pallas_call(
        _encoder_kernel,
        out_shape=(jax.ShapeDtypeStruct((b_sz, latent_dim), jnp.float32),
                   jax.ShapeDtypeStruct((b_sz, latent_dim), jnp.float32)),
        grid=grid,
        in_specs=[
            pl.BlockSpec((tb, d1, d2), lambda i: (i, 0, 0)),
            pl.BlockSpec((tb, latent_dim), lambda i: (i, 0)),
            pl.BlockSpec((n_layers, width, width), lambda i: (0, 0, 0)),
            pl.BlockSpec((n_layers, 1, width), lambda i: (0, 0, 0)),
        ],
        out_specs=(
            pl.BlockSpec((tb, latent_dim), lambda i: (i, 0)),
            pl.BlockSpec((tb, latent_dim), lambda i: (i, 0)),
        ),
        compiler_params=pltpu.CompilerParams(
            dimension_semantics=("parallel",),
            vmem_limit_bytes=vmem_limit,
        ),
    )(x, eps, w_slab, b_slab)
    return z, log_p


def pyt_encoder_forward(x, packed_params, eps, process):
    """Module-style API: one jitted kernel call; `process` only selects."""
    assert process in ("sample", "log_prob"), "TypeError!"
    w_slab, b_slab = packed_params
    z, log_p = _encoder_apply(x, eps, w_slab, b_slab)
    return z if process == "sample" else log_p


def _reference(x, eps, params):
    """Pure-JAX f32 reference mirroring the PyTorch module."""
    h = x.reshape(x.shape[0], -1)
    for w, b in params["net"]:
        h = _leaky_relu(h @ w + b)
    mu = _leaky_relu(h @ params["mu"][0] + params["mu"][1])
    log_var = _softplus(h @ params["log_var"][0] + params["log_var"][1])
    std = jnp.exp(0.5 * log_var)
    z = mu + std * eps
    d = z.shape[1]
    log_p = (-0.5 * d * jnp.log(2.0 * jnp.pi) - 0.5 * log_var
             - 0.5 * (z - mu) ** 2 * jnp.exp(-log_var))
    return z, log_p


if __name__ == "__main__":
    encoder_dims = [64, 32, 32]   # Flatten(1, 2): (B, 8, 8) -> (B, 64)
    latent_dim = 16
    batch = 2                     # NOTE: batch >= 8 (ideally 128+) fills MXU rows

    key = jax.random.PRNGKey(0)
    k_x, k_eps, k_p = jax.random.split(key, 3)

    x = jax.random.normal(k_x, (batch, 8, 8), jnp.float32)
    # TODO(synk): torch.randn_like uses torch's RNG stream; eps is drawn with
    # jax.random instead (same distribution) and passed in explicitly.
    eps = jax.random.normal(k_eps, (batch, latent_dim), jnp.float32)

    params = init_params(k_p, encoder_dims, latent_dim)
    packed = pack_params(params)

    z = pyt_encoder_forward(x, packed, eps, process="sample")
    log_p = pyt_encoder_forward(x, packed, eps, process="log_prob")
    jax.block_until_ready((z, log_p))

    assert z.shape == (batch, latent_dim) and log_p.shape == (batch, latent_dim)
    assert bool(jnp.all(jnp.isfinite(z))) and bool(jnp.all(jnp.isfinite(log_p)))

    # Loose check vs. pure-JAX f32 reference (kernel matmuls run in bf16 on MXU).
    z_ref, log_p_ref = _reference(x, eps, params)
    assert float(jnp.max(jnp.abs(z - z_ref))) < 0.1
    assert float(jnp.max(jnp.abs(log_p - log_p_ref))) < 0.1
    print("KERNEL_OK")
</pallas_src>

<mosaic_0001>
module attributes {stable_mosaic.version = 11 : i64} {
  func.func @_encoder_kernel(%arg0: i32, %arg1: memref<2x8x8xf32, #tpu.memory_space<vmem>>, %arg2: memref<2x16xf32, #tpu.memory_space<vmem>>, %arg3: memref<3x128x128xbf16, #tpu.memory_space<vmem>>, %arg4: memref<3x1x128xf32, #tpu.memory_space<vmem>>, %arg5: memref<2x16xf32, #tpu.memory_space<vmem>>, %arg6: memref<2x16xf32, #tpu.memory_space<vmem>>) attributes {dimension_semantics = [#tpu.dimension_semantics<parallel>], iteration_bounds = array<i64: 1>, scalar_prefetch = 0 : i64, scratch_operands = 0 : i64, tpu.core_type = #tpu.core_type<tc>, window_params = [{transform_indices = @transform_0, window_bounds = array<i64: 2, 8, 8>}, {transform_indices = @transform_1, window_bounds = array<i64: 2, 16>}, {pipeline_mode = #tpu.pipeline_mode<synchronous>, transform_indices = @transform_2, window_bounds = array<i64: 3, 128, 128>}, {pipeline_mode = #tpu.pipeline_mode<synchronous>, transform_indices = @transform_3, window_bounds = array<i64: 3, 1, 128>}, {transform_indices = @transform_4, window_bounds = array<i64: 2, 16>}, {transform_indices = @transform_5, window_bounds = array<i64: 2, 16>}]} {
    %c0 = arith.constant 0 : index
    %c0_0 = arith.constant 0 : index
    %c0_1 = arith.constant 0 : index
    %0 = vector.load %arg1[%c0, %c0_0, %c0_1] : memref<2x8x8xf32, #tpu.memory_space<vmem>>, vector<2x8x8xf32>
    %1 = vector.extract_strided_slice %0 {offsets = [0, 0, 0], sizes = [2, 1, 8], strides = [1, 1, 1]} : vector<2x8x8xf32> to vector<2x1x8xf32>
    %2 = vector.shape_cast %1 : vector<2x1x8xf32> to vector<2x8xf32>
    %3 = vector.extract_strided_slice %0 {offsets = [0, 1, 0], sizes = [2, 1, 8], strides = [1, 1, 1]} : vector<2x8x8xf32> to vector<2x1x8xf32>
    %4 = vector.shape_cast %3 : vector<2x1x8xf32> to vector<2x8xf32>
    %5 = vector.extract_strided_slice %0 {offsets = [0, 2, 0], sizes = [2, 1, 8], strides = [1, 1, 1]} : vector<2x8x8xf32> to vector<2x1x8xf32>
    %6 = vector.shape_cast %5 : vector<2x1x8xf32> to vector<2x8xf32>
    %7 = vector.extract_strided_slice %0 {offsets = [0, 3, 0], sizes = [2, 1, 8], strides = [1, 1, 1]} : vector<2x8x8xf32> to vector<2x1x8xf32>
    %8 = vector.shape_cast %7 : vector<2x1x8xf32> to vector<2x8xf32>
    %9 = vector.extract_strided_slice %0 {offsets = [0, 4, 0], sizes = [2, 1, 8], strides = [1, 1, 1]} : vector<2x8x8xf32> to vector<2x1x8xf32>
    %10 = vector.shape_cast %9 : vector<2x1x8xf32> to vector<2x8xf32>
    %11 = vector.extract_strided_slice %0 {offsets = [0, 5, 0], sizes = [2, 1, 8], strides = [1, 1, 1]} : vector<2x8x8xf32> to vector<2x1x8xf32>
    %12 = vector.shape_cast %11 : vector<2x1x8xf32> to vector<2x8xf32>
    %13 = vector.extract_strided_slice %0 {offsets = [0, 6, 0], sizes = [2, 1, 8], strides = [1, 1, 1]} : vector<2x8x8xf32> to vector<2x1x8xf32>
    %14 = vector.shape_cast %13 : vector<2x1x8xf32> to vector<2x8xf32>
    %15 = vector.extract_strided_slice %0 {offsets = [0, 7, 0], sizes = [2, 1, 8], strides = [1, 1, 1]} : vector<2x8x8xf32> to vector<2x1x8xf32>
    %16 = vector.shape_cast %15 : vector<2x1x8xf32> to vector<2x8xf32>
    %cst = arith.constant 0.000000e+00 : f32
    %17 = vector.broadcast %cst : f32 to vector<2x64xf32>
    %18 = tpu.concatenate %2, %4, %6, %8, %10, %12, %14, %16, %17 in 1 : vector<2x8xf32>, vector<2x8xf32>, vector<2x8xf32>, vector<2x8xf32>, vector<2x8xf32>, vector<2x8xf32>, vector<2x8xf32>, vector<2x8xf32>, vector<2x64xf32> -> vector<2x128xf32>
    %19 = arith.truncf %18 : vector<2x128xf32> to vector<2x128xbf16>
    %c0_2 = arith.constant 0 : index
    %c0_3 = arith.constant 0 : index
    %c0_4 = arith.constant 0 : index
    %20 = vector.load %arg3[%c0_2, %c0_3, %c0_4] : memref<3x128x128xbf16, #tpu.memory_space<vmem>>, vector<1x128x128xbf16>
    %21 = vector.shape_cast %20 : vector<1x128x128xbf16> to vector<128x128xbf16>
    %cst_5 = arith.constant dense<0.000000e+00> : vector<2x128xf32>
    %22 = tpu.matmul %19, %21, %cst_5 {dimension_numbers = #tpu.dot_dimension_numbers<[1], [0], [0], [1], [0, 0, 1, 1], [], []>} : vector<2x128xbf16>, vector<128x128xbf16>, vector<2x128xf32> -> vector<2x128xf32>
    %c0_6 = arith.constant 0 : index
    %c0_7 = arith.constant 0 : index
    %c0_8 = arith.constant 0 : index
    %23 = vector.load %arg4[%c0_6, %c0_7, %c0_8] : memref<3x1x128xf32, #tpu.memory_space<vmem>>, vector<1x1x128xf32>
    %24 = vector.shape_cast %23 : vector<1x1x128xf32> to vector<1x128xf32>
    %25 = vector.broadcast %24 : vector<1x128xf32> to vector<2x128xf32>
    %26 = arith.addf %22, %25 : vector<2x128xf32>
    %cst_9 = arith.constant 0.000000e+00 : f32
    %27 = vector.broadcast %cst_9 : f32 to vector<2x128xf32>
    %28 = arith.cmpf oge, %26, %27 : vector<2x128xf32>
    %cst_10 = arith.constant 0.00999999977 : f32
    %29 = vector.broadcast %cst_10 : f32 to vector<2x128xf32>
    %30 = arith.mulf %29, %26 : vector<2x128xf32>
    %31 = arith.select %28, %26, %30 : vector<2x128xi1>, vector<2x128xf32>
    %32 = arith.truncf %31 : vector<2x128xf32> to vector<2x128xbf16>
    %c1 = arith.constant 1 : index
    %c0_11 = arith.constant 0 : index
    %c0_12 = arith.constant 0 : index
    %33 = vector.load %arg3[%c1, %c0_11, %c0_12] : memref<3x128x128xbf16, #tpu.memory_space<vmem>>, vector<1x128x128xbf16>
    %34 = vector.shape_cast %33 : vector<1x128x128xbf16> to vector<128x128xbf16>
    %cst_13 = arith.constant dense<0.000000e+00> : vector<2x128xf32>
    %35 = tpu.matmul %32, %34, %cst_13 {dimension_numbers = #tpu.dot_dimension_numbers<[1], [0], [0], [1], [0, 0, 1, 1], [], []>} : vector<2x128xbf16>, vector<128x128xbf16>, vector<2x128xf32> -> vector<2x128xf32>
    %c1_14 = arith.constant 1 : index
    %c0_15 = arith.constant 0 : index
    %c0_16 = arith.constant 0 : index
    %36 = vector.load %arg4[%c1_14, %c0_15, %c0_16] : memref<3x1x128xf32, #tpu.memory_space<vmem>>, vector<1x1x128xf32>
    %37 = vector.shape_cast %36 : vector<1x1x128xf32> to vector<1x128xf32>
    %38 = vector.broadcast %37 : vector<1x128xf32> to vector<2x128xf32>
    %39 = arith.addf %35, %38 : vector<2x128xf32>
    %cst_17 = arith.constant 0.000000e+00 : f32
    %40 = vector.broadcast %cst_17 : f32 to vector<2x128xf32>
    %41 = arith.cmpf oge, %39, %40 : vector<2x128xf32>
    %cst_18 = arith.constant 0.00999999977 : f32
    %42 = vector.broadcast %cst_18 : f32 to vector<2x128xf32>
    %43 = arith.mulf %42, %39 : vector<2x128xf32>
    %44 = arith.select %41, %39, %43 : vector<2x128xi1>, vector<2x128xf32>
    %45 = arith.truncf %44 : vector<2x128xf32> to vector<2x128xbf16>
    %c2 = arith.constant 2 : index
    %c0_19 = arith.constant 0 : index
    %c0_20 = arith.constant 0 : index
    %46 = vector.load %arg3[%c2, %c0_19, %c0_20] : memref<3x128x128xbf16, #tpu.memory_space<vmem>>, vector<1x128x128xbf16>
    %47 = vector.shape_cast %46 : vector<1x128x128xbf16> to vector<128x128xbf16>
    %cst_21 = arith.constant dense<0.000000e+00> : vector<2x128xf32>
    %48 = tpu.matmul %45, %47, %cst_21 {dimension_numbers = #tpu.dot_dimension_numbers<[1], [0], [0], [1], [0, 0, 1, 1], [], []>} : vector<2x128xbf16>, vector<128x128xbf16>, vector<2x128xf32> -> vector<2x128xf32>
    %c2_22 = arith.constant 2 : index
    %c0_23 = arith.constant 0 : index
    %c0_24 = arith.constant 0 : index
    %49 = vector.load %arg4[%c2_22, %c0_23, %c0_24] : memref<3x1x128xf32, #tpu.memory_space<vmem>>, vector<1x1x128xf32>
    %50 = vector.shape_cast %49 : vector<1x1x128xf32> to vector<1x128xf32>
    %51 = vector.broadcast %50 : vector<1x128xf32> to vector<2x128xf32>
    %52 = arith.addf %48, %51 : vector<2x128xf32>
    %53 = vector.extract_strided_slice %52 {offsets = [0, 0], sizes = [2, 16], strides = [1, 1]} : vector<2x128xf32> to vector<2x16xf32>
    %cst_25 = arith.constant 0.000000e+00 : f32
    %54 = vector.broadcast %cst_25 : f32 to vector<2x16xf32>
    %55 = arith.cmpf oge, %53, %54 : vector<2x16xf32>
    %cst_26 = arith.constant 0.00999999977 : f32
    %56 = vector.broadcast %cst_26 : f32 to vector<2x16xf32>
    %57 = arith.mulf %56, %53 : vector<2x16xf32>
    %58 = arith.select %55, %53, %57 : vector<2x16xi1>, vector<2x16xf32>
    %59 = vector.extract_strided_slice %52 {offsets = [0, 16], sizes = [2, 16], strides = [1, 1]} : vector<2x128xf32> to vector<2x16xf32>
    %cst_27 = arith.constant 2.000000e+01 : f32
    %60 = vector.broadcast %cst_27 : f32 to vector<2x16xf32>
    %61 = arith.minimumf %59, %60 : vector<2x16xf32>
    %cst_28 = arith.constant 2.000000e+01 : f32
    %62 = vector.broadcast %cst_28 : f32 to vector<2x16xf32>
    %63 = arith.cmpf ogt, %59, %62 : vector<2x16xf32>
    %64 = math.exp %61 : vector<2x16xf32>
    %65 = math.log1p %64 : vector<2x16xf32>
    %66 = arith.select %63, %59, %65 : vector<2x16xi1>, vector<2x16xf32>
    %c0_29 = arith.constant 0 : index
    %c0_30 = arith.constant 0 : index
    %67 = vector.load %arg2[%c0_29, %c0_30] : memref<2x16xf32, #tpu.memory_space<vmem>>, vector<2x16xf32>
    %cst_31 = arith.constant 5.000000e-01 : f32
    %68 = vector.broadcast %cst_31 : f32 to vector<2x16xf32>
    %69 = arith.mulf %68, %66 : vector<2x16xf32>
    %70 = math.exp %69 : vector<2x16xf32>
    %71 = arith.mulf %70, %67 : vector<2x16xf32>
    %72 = arith.addf %58, %71 : vector<2x16xf32>
    %cst_32 = arith.constant 5.000000e-01 : f32
    %73 = vector.broadcast %cst_32 : f32 to vector<2x16xf32>
    %74 = arith.mulf %73, %66 : vector<2x16xf32>
    %cst_33 = arith.constant -14.7030163 : f32
    %75 = vector.broadcast %cst_33 : f32 to vector<2x16xf32>
    %76 = arith.subf %75, %74 : vector<2x16xf32>
    %77 = arith.mulf %67, %67 : vector<2x16xf32>
    %cst_34 = arith.constant 5.000000e-01 : f32
    %78 = vector.broadcast %cst_34 : f32 to vector<2x16xf32>
    %79 = arith.mulf %78, %77 : vector<2x16xf32>
    %80 = arith.subf %76, %79 : vector<2x16xf32>
    %c0_35 = arith.constant 0 : index
    %c0_36 = arith.constant 0 : index
    %81 = vector.load %arg5[%c0_35, %c0_36] : memref<2x16xf32, #tpu.memory_space<vmem>>, vector<2x16xf32>
    tpu.vector_store %arg5[%c0_35, %c0_36], %72 {strides = array<i32>} : memref<2x16xf32, #tpu.memory_space<vmem>>, vector<2x16xf32>,
    %c0_37 = arith.constant 0 : index
    %c0_38 = arith.constant 0 : index
    %82 = vector.load %arg6[%c0_37, %c0_38] : memref<2x16xf32, #tpu.memory_space<vmem>>, vector<2x16xf32>
    tpu.vector_store %arg6[%c0_37, %c0_38], %80 {strides = array<i32>} : memref<2x16xf32, #tpu.memory_space<vmem>>, vector<2x16xf32>,
    return
  }
  func.func @transform_0(%arg0: i32) -> (i32, i32, i32) {
    %c0_i32 = arith.constant 0 : i32
    %c0_i32_0 = arith.constant 0 : i32
    %c0_i32_1 = arith.constant 0 : i32
    return %arg0, %c0_i32, %c0_i32_0 : i32, i32, i32
  }
  func.func @transform_1(%arg0: i32) -> (i32, i32) {
    %c0_i32 = arith.constant 0 : i32
    %c0_i32_0 = arith.constant 0 : i32
    return %arg0, %c0_i32 : i32, i32
  }
  func.func @transform_2(%arg0: i32) -> (i32, i32, i32) {
    %c0_i32 = arith.constant 0 : i32
    %c0_i32_0 = arith.constant 0 : i32
    %c0_i32_1 = arith.constant 0 : i32
    %c0_i32_2 = arith.constant 0 : i32
    return %c0_i32, %c0_i32_0, %c0_i32_1 : i32, i32, i32
  }
  func.func @transform_3(%arg0: i32) -> (i32, i32, i32) {
    %c0_i32 = arith.constant 0 : i32
    %c0_i32_0 = arith.constant 0 : i32
    %c0_i32_1 = arith.constant 0 : i32
    %c0_i32_2 = arith.constant 0 : i32
    return %c0_i32, %c0_i32_0, %c0_i32_1 : i32, i32, i32
  }
  func.func @transform_4(%arg0: i32) -> (i32, i32) {
    %c0_i32 = arith.constant 0 : i32
    %c0_i32_0 = arith.constant 0 : i32
    return %arg0, %c0_i32 : i32, i32
  }
  func.func @transform_5(%arg0: i32) -> (i32, i32) {
    %c0_i32 = arith.constant 0 : i32
    %c0_i32_0 = arith.constant 0 : i32
    return %arg0, %c0_i32 : i32, i32
  }
}

</mosaic_0001>

<bundles_post_ra>
// kernel: _encoder_apply.1
= control target key start
LH: loop header
LB: loop body
LE: loop exit
PB: predicated region body
PF: predicated region fallthrough
CT: control target
= control target key end

     0   :  { %11 = vsyncpa [#allocation3], 0  ;;  %s891_s0 = inlined_call_operand.hbm [shape: f32[2,8,8], index: 0, kind: input, shape index: {}]   ;;  %s892_s1 = inlined_call_operand.hbm [shape: f32[2,16], index: 1, kind: input, shape index: {}]   ;;  %s893_s2 = inlined_call_operand.hbm [shape: bf16[3,128,128], index: 2, kind: input, shape index: {}]   ;;  %s894_s3 = inlined_call_operand.hbm [shape: f32[3,1,128], index: 3, kind: input, shape index: {}]   ;;  %s895_s4 = inlined_call_operand.hbm [shape: f32[2,16], index: 4, kind: output, shape index: {0}]   ;;  %s896_s5 = inlined_call_operand.hbm [shape: f32[2,16], index: 5, kind: output, shape index: {1}]  }
   0x1   :  { %12 = vsyncpa [#allocation6], 0 }
   0x2   :  { %13 = vsyncpa [#allocation9], 0 }
   0x3   :  { %14 = vsyncpa [#allocation4], 0  ;;  %s34_s20 = sshll.u32 %s892_s1, 4  ;;  %s35_s20 = int_to_ptr.hbm [resolvable:$true] %s34_s20 }
   0x4   :  { %15 = vsyncpa [#allocation12], 0  ;;  %s788_s21 = smov [#allocation5]   ;;  %s20_s25 = sshll.u32 %s891_s0, 4  ;;  %s21_s25 = int_to_ptr.hbm [resolvable:$true] %s20_s25 }
   0x5   :  { %s36_s22 = sshll.u32 %s788_s21, 4  ;;  %s789_s26 = smov [#allocation2]   ;;  %s37_s22 = int_to_ptr.vmem [resolvable:$true] %s36_s22 }
   0x6   :  { %39 = dma.hbm_to_vmem [thread:$0]  %s35_s20, 32, %s37_s22, [#allocation6]  }
   0x7   :  { %s22_s27 = sshll.u32 %s789_s26, 4  ;;  %s790_s28 = smov 128   ;;  %s23_s27 = int_to_ptr.vmem [resolvable:$true] %s22_s27 }
   0x8   :  { %s791_s29 = smov 8   ;;  %s44_s6 = sshll.u32 %s893_s2, 4  ;;  %s45_s6 = int_to_ptr.hbm [resolvable:$true] %s44_s6 }
   0x9   :  { %28 = dma.hbm_to_vmem [thread:$0]  %s21_s25, 256, %s23_s27, [#allocation3], %s790_s28, %s790_s28, %s791_s29  }
   0xa   :  { %s792_s7 = smov [#allocation7]   ;;  %s57_s0 = sshll.u32 %s894_s3, 4  ;;  %s58_s0 = int_to_ptr.hbm [resolvable:$true] %s57_s0 }
   0xb   :  { %s46_s8 = sshll.u32 %s792_s7, 4  ;;  %s793_s11 = smov 64   ;;  %s47_s8 = int_to_ptr.vmem [resolvable:$true] %s46_s8 }
   0xc   :  { %s794_s12 = smov 4   ;;  %s795_s13 = smov [#allocation8]  }
   0xd   :  { %52 = dma.hbm_to_vmem [thread:$0]  %s45_s6, 3072, %s47_s8, [#allocation6], %s793_s11, %s793_s11, %s794_s12  }
   0xe   :  { %s59_s14 = sshll.u32 %s795_s13, 4  ;;  %s796_s15 = smov 16   ;;  %s60_s14 = int_to_ptr.vmem [resolvable:$true] %s59_s14 }
   0xf   :  { %s797_s16 = smov 1  }
  0x10   :  { %65 = dma.hbm_to_vmem [thread:$0]  %s58_s0, 48, %s60_s14, [#allocation9], %s796_s15, %s796_s15, %s797_s16  }
  0x11   :  { %778 = dma.done.wait [#allocation3], 256  }
  0x12   :  { %779 = vsyncadd [#allocation3], 4294967040 }
  0x13   :  { %780 = dma.done.wait [#allocation6], 3104  }
  0x14   :  { %781 = vsyncadd [#allocation6], 4294964192 }
  0x15   :  { %782 = dma.done.wait [#allocation9], 48  }
  0x16   :  { %783 = vsyncadd [#allocation9], 4294967248  ;;  %v851_v0 = vld [vmem:[#allocation2] sm:$0xff]  ;;  %v853_v1 = vld [vmem:[#allocation2 + $0x8] sm:$0xff]  ;;  %vm87_vm0 = vcmask 1041409   ;;  %s798_s2 = smov 24  }
  0x17   :  { %v590_v2 = vld [vmem:[#allocation7 + $0x38] sm:$0xff]  ;;  %v90_v3 = vrot.slane %v851_v0, 1  ;;  %v101_v4 = vrot.slane %v851_v0, 3  ;;  %v102_v5 = vrot.slane %v853_v1, 2  ;;  %v589_v6 = vld [vmem:[#allocation7 + $0x30] sm:$0xff]  ;;  %v113_v9 = vrot.slane %v851_v0, 5 }
  0x18   :  { %216 = vmatpush.bf16.msra.mxu0 %v590_v2  ;;  %v114_v10 = vrot.slane %v853_v1, 4  ;;  %v95_v11 = vrot.slane %v851_v0, 2  ;;  %v96_v12 = vrot.slane %v853_v1, 1  ;;  %v107_v13 = vrot.slane %v851_v0, 4  ;;  %v588_v16 = vld [vmem:[#allocation7 + $0x28] sm:$0xff]  ;;  %s799_s3 = smov 40  }
  0x19   :  { %v91_v7 = vsel %vm87_vm0, %v853_v1, %v90_v3  ;;  %v103_v8 = vsel %vm87_vm0, %v102_v5, %v101_v4  ;;  %v108_v14 = vrot.slane %v853_v1, 3  ;;  %v119_v17 = vrot.slane %v851_v0, 6  ;;  %s800_s17 = smov 32   ;;  %s801_s18 = smov 48   ;;  %v587_v25 = vld [vmem:[#allocation7 + $0x20] sm:$0xff]  ;;  %v586_v26 = vld [vmem:[#allocation7 + $0x18] sm:$0xff] }
  0x1a   :  { %92 = vrot.lane.b32.xlu0 %v91_v7, %s791_s29  ;;  %104 = vrot.lane.b32.xlu1 %v103_v8, %s798_s2  ;;  %v115_v15 = vsel %vm87_vm0, %v114_v10, %v113_v9  ;;  %v120_v18 = vrot.slane %v853_v1, 5  ;;  %v97_v19 = vsel %vm87_vm0, %v96_v12, %v95_v11  ;;  %v125_v22 = vrot.slane %v851_v0, 7  ;;  %s802_s19 = smov 56   ;;  %v585_v27 = vld [vmem:[#allocation7 + $0x10] sm:$0xff]  ;;  %v584_v28 = vld [vmem:[#allocation7 + $0x8] sm:$0xff]  ;;  %v583_v29 = vld [vmem:[#allocation7] sm:$0xff] }
  0x1b   :  { %116 = vrot.lane.b32.xlu2 %v115_v15, %s799_s3  ;;  %v109_v20 = vsel %vm87_vm0, %v108_v14, %v107_v13  ;;  %v126_v23 = vrot.slane %v853_v1, 6  ;;  %v598_v30 = vld [vmem:[#allocation7 + $0x78] sm:$0xff]  ;;  %v597_v31 = vld [vmem:[#allocation7 + $0x70] sm:$0xff]  ;;  %v596_v32 = vld [vmem:[#allocation7 + $0x68] sm:$0xff]  ;;  %v86_v36 = vrot.slane %v853_v1, 7  ;;  %vm131_vm1 = vcmask 64512  }
  0x1c   :  { %217 = vmatpush.bf16.msra.mxu0 %v589_v6  ;;  %v121_v21 = vsel %vm87_vm0, %v120_v18, %v119_v17  ;;  %303 = vmatpush.bf16.msra.mxu1 %v598_v30  ;;  %v595_v33 = vld [vmem:[#allocation7 + $0x60] sm:$0xff]  ;;  %v594_v37 = vld [vmem:[#allocation7 + $0x58] sm:$0xff]  ;;  %vm133_vm2 = vcmask 130048   ;;  %v593_v40 = vld [vmem:[#allocation7 + $0x50] sm:$0xff]  ;;  %vm135_vm3 = vcmask 195584   ;;  %vm137_vm4 = vcmask 261120  }
  0x1d   :  { %v127_v24 = vsel %vm87_vm0, %v126_v23, %v125_v22  ;;  %v88_v39 = vsel %vm87_vm0, %v86_v36, %v851_v0  ;;  %vm139_vm5 = vcmask 326656   ;;  %vm141_vm6 = vcmask 392192   ;;  %v592_v53 = vld [vmem:[#allocation7 + $0x48] sm:$0xff]  ;;  %v591_v54 = vld [vmem:[#allocation7 + $0x40] sm:$0xff]  ;;  %v606_v55 = vld [vmem:[#allocation7 + $0xb8] sm:$0xff]  ;;  %s803_s20 = smov 112  }
  0x1e   :  { %vm143_vm7 = vcmask 457728   ;;  %vm145_vm8 = vcmask 523264   ;;  %390 = vmatpush.bf16.msra.mxu2 %v606_v55  ;;  %v605_v56 = vld [vmem:[#allocation7 + $0xb0] sm:$0xff]  ;;  %v604_v57 = vld [vmem:[#allocation7 + $0xa8] sm:$0xff]  ;;  %v603_v58 = vld [vmem:[#allocation7 + $0xa0] sm:$0xff]  ;;  %s804_s21 = smov [#allocation11]  }
  0x1f   :  { %vm516_vm9 = vmpackc.low %vm145_vm8, %vm145_vm8  ;;  %v602_v59 = vld [vmem:[#allocation7 + $0x98] sm:$0xff]  ;;  %v601_v60 = vld [vmem:[#allocation7 + $0x90] sm:$0xff]  ;;  %s465_s22 = sshll.u32 %s804_s21, 4  ;;  %s467_s25 = sshll.u32 %s896_s5, 4  ;;  %vm442_vm14 = vcmask 123904   ;;  %s466_s22 = int_to_ptr.vmem [resolvable:$true] %s465_s22  ;;  %s468_s25 = int_to_ptr.hbm [resolvable:$true] %s467_s25 }
  0x20   :  { %218 = vmatpush.bf16.msra.mxu0 %v588_v16  ;;  %304 = vmatpush.bf16.msra.mxu1 %v597_v31  ;;  %v625_v61 = vld [vmem:[#allocation8] ss:$0 sm:$0xff]  ;;  %v600_v4 = vld [vmem:[#allocation7 + $0x88] sm:$0xff]  ;;  %v420_v6 = vld [vmem:[#allocation5] sm:$0x3]  ;;  %s805_s26 = smov [#allocation10]  }
  0x21   :  { %v599_v5 = vld [vmem:[#allocation7 + $0x80] sm:$0xff]  ;;  %v435_v7 = vmul.f32 %v420_v6, %v420_v6  ;;  %s454_s27 = sshll.u32 %s805_s26, 4  ;;  %s456_s30 = sshll.u32 %s895_s4, 4  ;;  %s455_s27 = int_to_ptr.vmem [resolvable:$true] %s454_s27  ;;  %s457_s30 = int_to_ptr.hbm [resolvable:$true] %s456_s30 }
  0x22   :  { %98 = vrot.lane.b32.xlu0 %v97_v19, %s796_s15  ;;  %110 = vrot.lane.b32.xlu1 %v109_v20, %s800_s17  ;;  %v626_v9 = vld [vmem:[#allocation8 + $0x1] ss:$0 sm:$0xff]  ;;  %v627_v16 = vld [vmem:[#allocation8 + $0x2] ss:$0 sm:$0xff] }
  0x23   :  { %122 = vrot.lane.b32.xlu2 %v121_v21, %s801_s18  ;;  %391 = vmatpush.bf16.msra.mxu2 %v605_v56  ;;  %v436_v8 = vmul.f32 0.5, %v435_v7 }
  0x24   :  { %219 = vmatpush.bf16.msra.mxu0 %v587_v25  ;;  %305 = vmatpush.bf16.msra.mxu1 %v596_v32 }
  0x27   :  { %392 = vmatpush.bf16.msra.mxu2 %v604_v57 }
  0x28   :  { %220 = vmatpush.bf16.msra.mxu0 %v586_v26  ;;  %306 = vmatpush.bf16.msra.mxu1 %v595_v33 }
  0x2a   :  { %128 = vrot.lane.b32.xlu0 %v127_v24, %s802_s19  ;;  %425 = vrot.lane.b32.xlu1 %v420_v6, %s796_s15 }
  0x2b   :  { %393 = vmatpush.bf16.msra.mxu2 %v603_v58  ;;  %438 = vrot.lane.b32.xlu2 %v436_v8, %s796_s15 }
  0x2c   :  { %221 = vmatpush.bf16.msra.mxu0 %v585_v27  ;;  %307 = vmatpush.bf16.msra.mxu1 %v594_v37 }
  0x2f   :  { %394 = vmatpush.bf16.msra.mxu2 %v602_v59 }
  0x30   :  { %222 = vmatpush.bf16.msra.mxu0 %v584_v28  ;;  %308 = vmatpush.bf16.msra.mxu1 %v593_v40 }
  0x33   :  { %395 = vmatpush.bf16.msra.mxu2 %v601_v60 }
  0x34   :  { %223 = vmatpush.bf16.msra.mxu0 %v583_v29  ;;  %309 = vmatpush.bf16.msra.mxu1 %v592_v53 }
  0x37   :  { %396 = vmatpush.bf16.msra.mxu2 %v600_v4 }
  0x38   :  { %310 = vmatpush.bf16.msra.mxu1 %v591_v54 }
  0x3b   :  { %397 = vmatpush.bf16.msra.mxu2 %v599_v5 }
  0x75   :  { %v117_v38 = vpop.permute.xlu2 %116 }
  0x7d   :  { %v123_v47 = vpop.permute.xlu2 %122 }
  0x85   :  { %v439_v33 = vpop.permute.xlu2 %438 }
  0x8c   :  { %v93_v34 = vpop.permute.xlu0 %92  ;;  %v105_v35 = vpop.permute.xlu1 %104 }
  0x8d   :  { %v132_v41 = vsel %vm131_vm1, %v88_v39, %v93_v34 }
  0x94   :  { %v99_v42 = vpop.permute.xlu0 %98  ;;  %v111_v43 = vpop.permute.xlu1 %110 }
  0x95   :  { %v134_v44 = vsel %vm133_vm2, %v132_v41, %v99_v42 }
  0x96   :  { %v136_v45 = vsel %vm135_vm3, %v134_v44, %v105_v35 }
  0x97   :  { %v138_v46 = vsel %vm137_vm4, %v136_v45, %v111_v43 }
  0x98   :  { %v140_v48 = vsel %vm139_vm5, %v138_v46, %v117_v38 }
  0x99   :  { %v142_v49 = vsel %vm141_vm6, %v140_v48, %v123_v47 }
  0x9c   :  { %v129_v50 = vpop.permute.xlu0 %128  ;;  %v426_v37 = vpop.permute.xlu1 %425 }
  0x9d   :  { %v144_v51 = vsel %vm143_vm7, %v142_v49, %v129_v50 }
  0x9e   :  { %v517_v52 = vpack.c.bf16 %v144_v51, %v144_v51 }
  0xa0   :  { %518 = vmatmul.msk.bf16.vlgmr.msra.gmra.mxu0 %vm516_vm9, %v517_v52 }
 0x11d   :  { %v225_v62 = vpop.f32.mrf.mxu0 }
 0x11e   :  { %v226_v63 = vadd.f32 %v625_v61, %v225_v62 }
 0x120   :  { %v230_v0 = vmul.f32 0.01, %v226_v63  ;;  %vm229_vm10 = vcmp.ge.f32.partialorder %v226_v63, 0.0 }
 0x122   :  { %v231_v1 = vsel %vm229_vm10, %v226_v63, %v230_v0 }
 0x123   :  { %v232_v2 = vpack.c.bf16 %v231_v1, %v231_v1 }
 0x125   :  { %v227_v3 = vpop.f32.mrf.mxu0  ;;  %311 = vmatmul.bf16.vlgmr.msra.gmra.mxu1 %v232_v2 }
 0x1a2   :  { %v312_v10 = vpop.f32.mrf.mxu1 }
 0x1a3   :  { %v313_v11 = vadd.f32 %v626_v9, %v312_v10 }
 0x1a5   :  { %v317_v12 = vmul.f32 0.01, %v313_v11  ;;  %vm316_vm11 = vcmp.ge.f32.partialorder %v313_v11, 0.0 }
 0x1a7   :  { %v318_v13 = vsel %vm316_vm11, %v313_v11, %v317_v12 }
 0x1a8   :  { %v319_v14 = vpack.c.bf16 %v318_v13, %v318_v13 }
 0x1aa   :  { %v314_v15 = vpop.f32.mrf.mxu1  ;;  %398 = vmatmul.bf16.vlgmr.msra.gmra.mxu2 %v319_v14 }
 0x22d   :  { %v399_v17 = vpop.f32.mrf.mxu2 }
 0x22e   :  { %v400_v18 = vadd.f32 %v627_v16, %v399_v17 }
 0x230   :  { %v406_v19 = vmin.f32 %v400_v18, 20.0  ;;  %vm407_vm13 = vcmp.gt.f32.partialorder %v400_v18, 20.0  ;;  %v404_v41 = vmul.f32 0.01, %v400_v18  ;;  %vm403_vm15 = vcmp.ge.f32.partialorder %v400_v18, 0.0 }
 0x232   :  { %v408_v20 = vmul.f32 1.442695, %v406_v19  ;;  %v405_v43 = vsel %vm403_vm15, %v400_v18, %v404_v41 }
 0x234   :  { %628 = vpow2.f32 %v408_v20 }
 0x235   :  { %v401_v21 = vpop.f32.mrf.mxu2 }
 0x23a   :  { %v629_v22 = vpop.eup %628 }
 0x23b   :  { %v410_v23 = vadd.f32 1.0, %v629_v22  ;;  %v413_v24 = vmul.f32 -0.5, %v629_v22  ;;  %v416_v26 = vand.u32 2147483647, %v629_v22 }
 0x23d   :  { %630 = vlog2.f32 %v410_v23  ;;  %v414_v25 = vadd.f32 1.0, %v413_v24  ;;  %vm417_vm12 = vcmp.lt.f32.partialorder %v416_v26, 0.0004427343 }
 0x23f   :  { %v415_v29 = vmul.f32 %v629_v22, %v414_v25 }
 0x243   :  { %v631_v27 = vpop.eup %630 }
 0x244   :  { %v412_v28 = vmul.f32 0.6931472, %v631_v27 }
 0x246   :  { %v418_v30 = vsel %vm417_vm12, %v415_v29, %v412_v28 }
 0x247   :  { %v419_v31 = vsel %vm407_vm13, %v400_v18, %v418_v30 }
 0x248   :  { %v421_v32 = vmul.f32 0.5, %v419_v31 }
 0x24a   :  { %v422_v34 = vmul.f32 1.442695, %v421_v32  ;;  %v434_v35 = vsub.f32 -14.703016, %v421_v32 }
 0x24c   :  { %632 = vpow2.f32 %v422_v34  ;;  %v441_v36 = vsub.f32 %v434_v35, %v439_v33 }
 0x24e   :  { %445 = vrot.lane.b32.xlu1 %v441_v36, %s803_s20 }
 0x252   :  { %v633_v38 = vpop.eup %632 }
 0x253   :  { %v428_v39 = vmul.f32 %v633_v38, %v426_v37 }
 0x255   :  { %430 = vrot.lane.b32.xlu0 %v428_v39, %s803_s20 }
 0x2c0   :  { %v446_v40 = vpop.permute.xlu1 %445 }
 0x2c1   :  { %448 = vst.msk [vmem:[#allocation11] sm:$0x3] %vm442_vm14, %v446_v40 }
 0x2c2   :  { %470 = dma.vmem_to_hbm [thread:$0]  %s466_s22, 32, %s468_s25, [#allocation12]  }
 0x2c7   :  { %v431_v42 = vpop.permute.xlu0 %430 }
 0x2c8   :  { %v433_v44 = vadd.f32 %v431_v42, %v405_v43 }
 0x2ca   :  { %443 = vst.msk [vmem:[#allocation10] sm:$0x3] %vm442_vm14, %v433_v44 }
 0x2cb   :  { %459 = dma.vmem_to_hbm [thread:$0]  %s455_s27, 32, %s457_s30, [#allocation4]  }
 0x2cc   :  { %784 = dma.done.wait [#allocation4], 32  }
 0x2cd   :  { %785 = vsyncadd [#allocation4], 4294967264 }
 0x2ce   :  { %786 = dma.done.wait [#allocation12], 32  }
 0x2cf   :  { %787 = vsyncadd [#allocation12], 4294967264 }
 0x2d0   :  { %479 = vsyncpa [#allocation3], 1 }
 0x2d1   :  { %480 = vsyncpa [#allocation6], 1 }
 0x2d2   :  { %481 = vsyncpa [#allocation9], 1 }
 0x2d3   :  { %482 = vsyncpa [#allocation4], 1 }
 0x2d4   :  { %483 = vsyncpa [#allocation12], 1 }

</bundles_post_ra>
